<compile_context>
chip_gen: v7x
topology: tpu7x:2x2x1
jax: 0.10.0
libtpu: 0.0.40
codegen_flags: <defaults>
</compile_context>

<pallas_src>
import math
import jax
import jax.numpy as jnp
from jax.experimental import pallas as pl
from jax.experimental.pallas import tpu as pltpu

# ---- small, module-consistent problem size -------------------------------
B = 2            # batch
S = 8            # sequence length
H = 32           # hidden_size
NUM_HEADS = 4    # num_heads (H % NUM_HEADS == 0)
HEAD_DIM = H // NUM_HEADS
MLP_RATIO = 4
HM = H * MLP_RATIO   # mlp hidden
LN_EPS = 1e-5        # PyTorch LayerNorm default
# packed weight slab columns: |Wqkv 0:96|pad|Wo 128:160|pad|W1 256:384|W2^T 384:512|
WCOLS = 512


def _layernorm(x, w, b):
    mean = jnp.mean(x, axis=-1, keepdims=True)
    var = jnp.mean((x - mean) ** 2, axis=-1, keepdims=True)
    return (x - mean) * jax.lax.rsqrt(var + LN_EPS) * w + b


def _gelu_exact(x):
    # PyTorch nn.GELU() default is the exact (erf) form.
    # TODO(synk): on v5e, jax.nn.gelu(approximate=True) would move this off the
    # VALU onto the EUP at the cost of tiny numerical deviation from PyTorch.
    return 0.5 * x * (1.0 + jax.lax.erf(x * (1.0 / math.sqrt(2.0))))


def _head_id(idx, block):
    # integer `idx // block` via static-unrolled compares (no in-kernel int division)
    return sum(((idx >= h * block).astype(jnp.int32) for h in range(1, NUM_HEADS)), 0)


def transformer_block_kernel(x_ref, wa_ref, vb_ref, o_ref):
    """One batch (S, H) per grid step; all weights stay VMEM-resident."""
    x = x_ref[...]                                     # (S, H)

    # ---- unpack packed slabs (every slice starts at lane 0 / a 128-lane boundary)
    wqkv = wa_ref[:, 0:3 * H]                          # (H, 3H)  q cols pre-scaled by 1/sqrt(dh)
    wo   = wa_ref[:, 128:128 + H]                      # (H, H)
    w1   = wa_ref[:, 256:256 + HM]                     # (H, HM)
    w2t  = wa_ref[:, 384:384 + HM]                     # (H, HM) == W2 in PyTorch (out,in) layout
    bqkv = vb_ref[0:1, 0:3 * H]                        # (1, 3H)
    bo   = vb_ref[0:1, 128:128 + H]                    # (1, H)
    b1   = vb_ref[0:1, 256:256 + HM]                   # (1, HM)
    ln1w = vb_ref[1:2, 0:H]
    ln1b = vb_ref[2:3, 0:H]
    ln2w = vb_ref[3:4, 0:H]
    ln2b = vb_ref[4:5, 0:H]
    b2   = vb_ref[5:6, 0:H]

    # ---- LayerNorm 1 + fused QKV projection (single K=H MXU push) ---------------
    n1 = _layernorm(x, ln1w, ln1b)
    qkv = jnp.dot(n1, wqkv, preferred_element_type=jnp.float32) + bqkv   # (S, 3H)
    q = qkv[:, 0:H]                                    # already scaled by 1/sqrt(dh)
    k = qkv[:, H:2 * H]
    v = qkv[:, 2 * H:3 * H]

    # ---- all-head attention via expanded block-diagonal K/V (no per-head loop) --
    # Row r of the expanded operands is key/value token (r mod S) restricted to
    # head (r // S)'s feature block; all masks are built from iota compares.
    key_head = _head_id(jax.lax.broadcasted_iota(jnp.int32, (NUM_HEADS * S, 1), 0), S)
    dim_head = _head_id(jax.lax.broadcasted_iota(jnp.int32, (1, H), 1), HEAD_DIM)
    col_head = _head_id(jax.lax.broadcasted_iota(jnp.int32, (1, NUM_HEADS * S), 1), S)
    mask_kv = key_head == dim_head                                  # (NH*S, H)
    mask_nm = (key_head == col_head).astype(jnp.float32)            # (NH*S, NH*S)

    k_x = jnp.where(mask_kv, jnp.tile(k, (NUM_HEADS, 1)), 0.0)      # (NH*S, H)
    v_x = jnp.where(mask_kv, jnp.tile(v, (NUM_HEADS, 1)), 0.0)      # (NH*S, H)

    # scores for all heads at once: s[i, h*S + j] = <q_i, k_j> restricted to head h
    s = jax.lax.dot_general(q, k_x, (((1,), (1,)), ((), ())),
                            preferred_element_type=jnp.float32)     # (S, NH*S)
    # One global row max: subtracting the same constant from every column of a row
    # leaves each head's softmax unchanged and keeps all exponents <= 0.
    s = s - jnp.max(s, axis=-1, keepdims=True)
    p = jnp.exp(s)
    # per-head denominators, broadcast to each column of that head's block
    denom = jnp.dot(p, mask_nm, preferred_element_type=jnp.float32)  # (S, NH*S)
    p = p * pl.reciprocal(denom, approx=True)
    # context is already head-concatenated in (S, H) layout -> single out-proj matmul
    ctx = jnp.dot(p, v_x, preferred_element_type=jnp.float32)        # (S, H)
    attn = jnp.dot(ctx, wo, preferred_element_type=jnp.float32) + bo

    # (attention / residual dropout are identity in eval mode)
    x1 = x + attn                                      # residual 1

    # ---- LayerNorm 2 + MLP -------------------------------------------------------
    n2 = _layernorm(x1, ln2w, ln2b)
    h1 = jnp.dot(n2, w1, preferred_element_type=jnp.float32) + b1
    h1 = _gelu_exact(h1)
    mlp = jax.lax.dot_general(h1, w2t, (((1,), (1,)), ((), ())),
                              preferred_element_type=jnp.float32) + b2
    o_ref[...] = (x1 + mlp).astype(o_ref.dtype)        # residual 2


def transformer_block(x, packed):
    """x: (B, S, H) float32.  packed: dict with the two packed slabs (see pack_params)."""
    b, s, h = x.shape
    x2d = x.reshape(b * s, h)                          # flatten batch*seq (free in XLA)
    out2d = pl.pallas_call(
        transformer_block_kernel,
        out_shape=jax.ShapeDtypeStruct((b * s, h), jnp.float32),
        grid=(b,),
        in_specs=[
            pl.BlockSpec((s, h), lambda i: (i, 0)),            # one batch of activations
            pl.BlockSpec((H, WCOLS), lambda i: (0, 0)),        # weight slab, VMEM-resident
            pl.BlockSpec((8, WCOLS), lambda i: (0, 0)),        # bias / LN-vector slab
        ],
        out_specs=pl.BlockSpec((s, h), lambda i: (i, 0)),
        compiler_params=pltpu.CompilerParams(
            dimension_semantics=("parallel",),                 # v7x: 2 TCs, one batch each
            vmem_limit_bytes=32 * 1024 * 1024,                 # fits the v7x 64 MiB budget
        ),
    )(x2d, packed["wa"], packed["vb"])
    return out2d.reshape(b, s, h)


def init_params(key):
    """Synthetic parameters in PyTorch layouts (MultiheadAttention / LayerNorm / Linear)."""
    keys = jax.random.split(key, 8)
    sc = 0.05
    return {
        "in_proj_w": jax.random.normal(keys[0], (3 * H, H), jnp.float32) * sc,  # (3H, H)
        "in_proj_b": jax.random.normal(keys[1], (3 * H,), jnp.float32) * sc,
        "out_proj_w": jax.random.normal(keys[2], (H, H), jnp.float32) * sc,
        "out_proj_b": jax.random.normal(keys[3], (H,), jnp.float32) * sc,
        "w1": jax.random.normal(keys[4], (HM, H), jnp.float32) * sc,            # Linear(H,HM).weight
        "b1": jax.random.normal(keys[5], (HM,), jnp.float32) * sc,
        "w2": jax.random.normal(keys[6], (H, HM), jnp.float32) * sc,            # Linear(HM,H).weight
        "b2": jax.random.normal(keys[7], (H,), jnp.float32) * sc,
        "ln1_w": jnp.ones((H,), jnp.float32), "ln1_b": jnp.zeros((H,), jnp.float32),
        "ln2_w": jnp.ones((H,), jnp.float32), "ln2_b": jnp.zeros((H,), jnp.float32),
    }


def pack_params(p):
    """Wrapper-side layout plumbing (one-time): pack everything into two lane-dense
    slabs so the kernel has 3 inputs total and every unpack slice is 128-lane
    aligned.  1/sqrt(head_dim) is folded into the q columns / q bias.
    (At realistic sizes the weight slab could additionally be stored in bf16 for
    the v6e/v7x MXU; kept f32 here to match PyTorch numerics exactly.)"""
    scale = 1.0 / math.sqrt(HEAD_DIM)
    wq, wk, wv = jnp.split(p["in_proj_w"], 3, axis=0)            # (H, H) each, (out,in)
    wqkv = jnp.concatenate([wq.T * scale, wk.T, wv.T], axis=1)   # (H, 3H)
    bq, bk, bv = jnp.split(p["in_proj_b"], 3)
    bqkv = jnp.concatenate([bq * scale, bk, bv])                 # (3H,)
    zH = jnp.zeros((H, H), jnp.float32)
    wa = jnp.concatenate(
        [wqkv, zH, p["out_proj_w"].T, zH, zH, zH, p["w1"].T, p["w2"]], axis=1)  # (H, 512)

    def row(vec):
        return jnp.concatenate([vec, jnp.zeros((WCOLS - vec.shape[0],), jnp.float32)])

    row0 = jnp.concatenate([bqkv, jnp.zeros((32,), jnp.float32), p["out_proj_b"],
                            jnp.zeros((96,), jnp.float32), p["b1"],
                            jnp.zeros((128,), jnp.float32)])     # (512,)
    zrow = jnp.zeros((WCOLS,), jnp.float32)
    vb = jnp.stack([row0, row(p["ln1_w"]), row(p["ln1_b"]),
                    row(p["ln2_w"]), row(p["ln2_b"]), row(p["b2"]), zrow, zrow])  # (8, 512)
    return {"wa": wa, "vb": vb}


def reference_block(x, p):
    """Pure-JAX reference of the PyTorch forward (for correctness check)."""
    n1 = _layernorm(x, p["ln1_w"], p["ln1_b"])
    qkv = n1 @ p["in_proj_w"].T + p["in_proj_b"]
    q, k, v = jnp.split(qkv, 3, axis=-1)

    def heads(t):
        return t.reshape(B, S, NUM_HEADS, HEAD_DIM).transpose(0, 2, 1, 3)

    qh, kh, vh = heads(q), heads(k), heads(v)
    scores = jnp.einsum("bhqd,bhkd->bhqk", qh, kh) / math.sqrt(HEAD_DIM)
    attn = jax.nn.softmax(scores, axis=-1)
    ctx = jnp.einsum("bhqk,bhkd->bhqd", attn, vh).transpose(0, 2, 1, 3).reshape(B, S, H)
    attn_out = ctx @ p["out_proj_w"].T + p["out_proj_b"]
    x1 = x + attn_out
    n2 = _layernorm(x1, p["ln2_w"], p["ln2_b"])
    mlp = _gelu_exact(n2 @ p["w1"].T + p["b1"]) @ p["w2"].T + p["b2"]
    return x1 + mlp


if __name__ == "__main__":
    # TODO(synk): key_padding_mask (attention_mask) path not implemented; only the
    # attention_mask=None forward path is reproduced (dropout is identity in eval).
    key = jax.random.PRNGKey(0)
    kx, kp = jax.random.split(key)
    x = jax.random.normal(kx, (B, S, H), jnp.float32)
    params = init_params(kp)
    packed = pack_params(params)

    out = jax.block_until_ready(transformer_block(x, packed))
    ref = reference_block(x, params)
    assert out.shape == (B, S, H)
    # tolerance loosened slightly (2e-3) for the approx-EUP reciprocal in softmax
    assert jnp.allclose(out, ref, atol=2e-3, rtol=2e-3), "mismatch vs. JAX reference"
    print("KERNEL_OK")
</pallas_src>

<mosaic_0001>
module attributes {stable_mosaic.version = 11 : i64} {
  func.func @transformer_block_kernel(%arg0: i32, %arg1: memref<8x32xf32, #tpu.memory_space<vmem>>, %arg2: memref<32x512xf32, #tpu.memory_space<vmem>>, %arg3: memref<8x512xf32, #tpu.memory_space<vmem>>, %arg4: memref<8x32xf32, #tpu.memory_space<vmem>>) attributes {dimension_semantics = [#tpu.dimension_semantics<parallel>], iteration_bounds = array<i64: 2>, scalar_prefetch = 0 : i64, scratch_operands = 0 : i64, tpu.core_type = #tpu.core_type<tc>, window_params = [{transform_indices = @transform_0, window_bounds = array<i64: 8, 32>}, {pipeline_mode = #tpu.pipeline_mode<synchronous>, transform_indices = @transform_1, window_bounds = array<i64: 32, 512>}, {pipeline_mode = #tpu.pipeline_mode<synchronous>, transform_indices = @transform_2, window_bounds = array<i64: 8, 512>}, {transform_indices = @transform_3, window_bounds = array<i64: 8, 32>}]} {
    %c0 = arith.constant 0 : index
    %c0_0 = arith.constant 0 : index
    %0 = vector.load %arg1[%c0, %c0_0] : memref<8x32xf32, #tpu.memory_space<vmem>>, vector<8x32xf32>
    %c0_1 = arith.constant 0 : index
    %c0_2 = arith.constant 0 : index
    %1 = vector.load %arg2[%c0_1, %c0_2] : memref<32x512xf32, #tpu.memory_space<vmem>>, vector<32x96xf32>
    %c0_3 = arith.constant 0 : index
    %c128 = arith.constant 128 : index
    %2 = vector.load %arg2[%c0_3, %c128] : memref<32x512xf32, #tpu.memory_space<vmem>>, vector<32x32xf32>
    %c0_4 = arith.constant 0 : index
    %c256 = arith.constant 256 : index
    %3 = vector.load %arg2[%c0_4, %c256] : memref<32x512xf32, #tpu.memory_space<vmem>>, vector<32x128xf32>
    %c0_5 = arith.constant 0 : index
    %c384 = arith.constant 384 : index
    %4 = vector.load %arg2[%c0_5, %c384] : memref<32x512xf32, #tpu.memory_space<vmem>>, vector<32x128xf32>
    %c0_6 = arith.constant 0 : index
    %c0_7 = arith.constant 0 : index
    %5 = vector.load %arg3[%c0_6, %c0_7] : memref<8x512xf32, #tpu.memory_space<vmem>>, vector<1x96xf32>
    %c0_8 = arith.constant 0 : index
    %c128_9 = arith.constant 128 : index
    %6 = vector.load %arg3[%c0_8, %c128_9] : memref<8x512xf32, #tpu.memory_space<vmem>>, vector<1x32xf32>
    %c0_10 = arith.constant 0 : index
    %c256_11 = arith.constant 256 : index
    %7 = vector.load %arg3[%c0_10, %c256_11] : memref<8x512xf32, #tpu.memory_space<vmem>>, vector<1x128xf32>
    %c1 = arith.constant 1 : index
    %c0_12 = arith.constant 0 : index
    %8 = vector.load %arg3[%c1, %c0_12] : memref<8x512xf32, #tpu.memory_space<vmem>>, vector<1x32xf32>
    %c2 = arith.constant 2 : index
    %c0_13 = arith.constant 0 : index
    %9 = vector.load %arg3[%c2, %c0_13] : memref<8x512xf32, #tpu.memory_space<vmem>>, vector<1x32xf32>
    %c3 = arith.constant 3 : index
    %c0_14 = arith.constant 0 : index
    %10 = vector.load %arg3[%c3, %c0_14] : memref<8x512xf32, #tpu.memory_space<vmem>>, vector<1x32xf32>
    %c4 = arith.constant 4 : index
    %c0_15 = arith.constant 0 : index
    %11 = vector.load %arg3[%c4, %c0_15] : memref<8x512xf32, #tpu.memory_space<vmem>>, vector<1x32xf32>
    %c5 = arith.constant 5 : index
    %c0_16 = arith.constant 0 : index
    %12 = vector.load %arg3[%c5, %c0_16] : memref<8x512xf32, #tpu.memory_space<vmem>>, vector<1x32xf32>
    %cst = arith.constant dense<0.000000e+00> : vector<8xf32>
    %13 = vector.multi_reduction <add>, %0, %cst [1] : vector<8x32xf32> to vector<8xf32>
    %14 = vector.shape_cast %13 : vector<8xf32> to vector<8x1xf32>
    %cst_17 = arith.constant 3.200000e+01 : f32
    %15 = vector.broadcast %cst_17 : f32 to vector<8x1xf32>
    %16 = arith.divf %14, %15 : vector<8x1xf32>
    %17 = vector.broadcast %16 : vector<8x1xf32> to vector<8x32xf32>
    %18 = arith.subf %0, %17 : vector<8x32xf32>
    %19 = arith.mulf %18, %18 : vector<8x32xf32>
    %cst_18 = arith.constant dense<0.000000e+00> : vector<8xf32>
    %20 = vector.multi_reduction <add>, %19, %cst_18 [1] : vector<8x32xf32> to vector<8xf32>
    %21 = vector.shape_cast %20 : vector<8xf32> to vector<8x1xf32>
    %cst_19 = arith.constant 3.200000e+01 : f32
    %22 = vector.broadcast %cst_19 : f32 to vector<8x1xf32>
    %23 = arith.divf %21, %22 : vector<8x1xf32>
    %24 = vector.broadcast %16 : vector<8x1xf32> to vector<8x32xf32>
    %25 = arith.subf %0, %24 : vector<8x32xf32>
    %cst_20 = arith.constant 9.99999974E-6 : f32
    %26 = vector.broadcast %cst_20 : f32 to vector<8x1xf32>
    %27 = arith.addf %23, %26 : vector<8x1xf32>
    %28 = math.rsqrt %27 : vector<8x1xf32>
    %29 = vector.broadcast %28 : vector<8x1xf32> to vector<8x32xf32>
    %30 = arith.mulf %25, %29 : vector<8x32xf32>
    %31 = vector.broadcast %8 : vector<1x32xf32> to vector<8x32xf32>
    %32 = arith.mulf %30, %31 : vector<8x32xf32>
    %33 = vector.broadcast %9 : vector<1x32xf32> to vector<8x32xf32>
    %34 = arith.addf %32, %33 : vector<8x32xf32>
    %cst_21 = arith.constant dense<0.000000e+00> : vector<8x96xf32>
    %35 = tpu.matmul %34, %1, %cst_21 {dimension_numbers = #tpu.dot_dimension_numbers<[1], [0], [0], [1], [0, 0, 1, 1], [], []>} : vector<8x32xf32>, vector<32x96xf32>, vector<8x96xf32> -> vector<8x96xf32>
    %36 = vector.broadcast %5 : vector<1x96xf32> to vector<8x96xf32>
    %37 = arith.addf %35, %36 : vector<8x96xf32>
    %38 = vector.extract_strided_slice %37 {offsets = [0, 0], sizes = [8, 32], strides = [1, 1]} : vector<8x96xf32> to vector<8x32xf32>
    %39 = vector.extract_strided_slice %37 {offsets = [0, 32], sizes = [8, 32], strides = [1, 1]} : vector<8x96xf32> to vector<8x32xf32>
    %40 = vector.extract_strided_slice %37 {offsets = [0, 64], sizes = [8, 32], strides = [1, 1]} : vector<8x96xf32> to vector<8x32xf32>
    %41 = tpu.iota {dimensions = array<i32: 0>} : vector<32x1xi32>
    %c8_i32 = arith.constant 8 : i32
    %42 = vector.broadcast %c8_i32 : i32 to vector<32x1xi32>
    %43 = arith.cmpi sge, %41, %42 : vector<32x1xi32>
    %44 = arith.extui %43 : vector<32x1xi1> to vector<32x1xi32>
    %c0_i32 = arith.constant 0 : i32
    %45 = vector.broadcast %c0_i32 : i32 to vector<32x1xi32>
    %46 = arith.addi %45, %44 : vector<32x1xi32>
    %c16_i32 = arith.constant 16 : i32
    %47 = vector.broadcast %c16_i32 : i32 to vector<32x1xi32>
    %48 = arith.cmpi sge, %41, %47 : vector<32x1xi32>
    %49 = arith.extui %48 : vector<32x1xi1> to vector<32x1xi32>
    %50 = arith.addi %46, %49 : vector<32x1xi32>
    %c24_i32 = arith.constant 24 : i32
    %51 = vector.broadcast %c24_i32 : i32 to vector<32x1xi32>
    %52 = arith.cmpi sge, %41, %51 : vector<32x1xi32>
    %53 = arith.extui %52 : vector<32x1xi1> to vector<32x1xi32>
    %54 = arith.addi %50, %53 : vector<32x1xi32>
    %55 = tpu.iota {dimensions = array<i32: 1>} : vector<1x32xi32>
    %c8_i32_22 = arith.constant 8 : i32
    %56 = vector.broadcast %c8_i32_22 : i32 to vector<1x32xi32>
    %57 = arith.cmpi sge, %55, %56 : vector<1x32xi32>
    %58 = arith.extui %57 : vector<1x32xi1> to vector<1x32xi32>
    %c0_i32_23 = arith.constant 0 : i32
    %59 = vector.broadcast %c0_i32_23 : i32 to vector<1x32xi32>
    %60 = arith.addi %59, %58 : vector<1x32xi32>
    %c16_i32_24 = arith.constant 16 : i32
    %61 = vector.broadcast %c16_i32_24 : i32 to vector<1x32xi32>
    %62 = arith.cmpi sge, %55, %61 : vector<1x32xi32>
    %63 = arith.extui %62 : vector<1x32xi1> to vector<1x32xi32>
    %64 = arith.addi %60, %63 : vector<1x32xi32>
    %c24_i32_25 = arith.constant 24 : i32
    %65 = vector.broadcast %c24_i32_25 : i32 to vector<1x32xi32>
    %66 = arith.cmpi sge, %55, %65 : vector<1x32xi32>
    %67 = arith.extui %66 : vector<1x32xi1> to vector<1x32xi32>
    %68 = arith.addi %64, %67 : vector<1x32xi32>
    %69 = tpu.iota {dimensions = array<i32: 1>} : vector<1x32xi32>
    %c8_i32_26 = arith.constant 8 : i32
    %70 = vector.broadcast %c8_i32_26 : i32 to vector<1x32xi32>
    %71 = arith.cmpi sge, %69, %70 : vector<1x32xi32>
    %72 = arith.extui %71 : vector<1x32xi1> to vector<1x32xi32>
    %c0_i32_27 = arith.constant 0 : i32
    %73 = vector.broadcast %c0_i32_27 : i32 to vector<1x32xi32>
    %74 = arith.addi %73, %72 : vector<1x32xi32>
    %c16_i32_28 = arith.constant 16 : i32
    %75 = vector.broadcast %c16_i32_28 : i32 to vector<1x32xi32>
    %76 = arith.cmpi sge, %69, %75 : vector<1x32xi32>
    %77 = arith.extui %76 : vector<1x32xi1> to vector<1x32xi32>
    %78 = arith.addi %74, %77 : vector<1x32xi32>
    %c24_i32_29 = arith.constant 24 : i32
    %79 = vector.broadcast %c24_i32_29 : i32 to vector<1x32xi32>
    %80 = arith.cmpi sge, %69, %79 : vector<1x32xi32>
    %81 = arith.extui %80 : vector<1x32xi1> to vector<1x32xi32>
    %82 = arith.addi %78, %81 : vector<1x32xi32>
    %83 = vector.broadcast %54 : vector<32x1xi32> to vector<32x32xi32>
    %84 = vector.broadcast %68 : vector<1x32xi32> to vector<32x32xi32>
    %85 = arith.cmpi eq, %83, %84 : vector<32x32xi32>
    %86 = vector.broadcast %54 : vector<32x1xi32> to vector<32x32xi32>
    %87 = vector.broadcast %82 : vector<1x32xi32> to vector<32x32xi32>
    %88 = arith.cmpi eq, %86, %87 : vector<32x32xi32>
    %89 = arith.extui %88 : vector<32x32xi1> to vector<32x32xi32>
    %90 = arith.sitofp %89 : vector<32x32xi32> to vector<32x32xf32>
    %91 = tpu.concatenate %39, %39, %39, %39 in 0 : vector<8x32xf32>, vector<8x32xf32>, vector<8x32xf32>, vector<8x32xf32> -> vector<32x32xf32>
    %cst_30 = arith.constant 0.000000e+00 : f32
    %92 = vector.broadcast %cst_30 : f32 to vector<32x32xf32>
    %93 = arith.select %85, %91, %92 : vector<32x32xi1>, vector<32x32xf32>
    %94 = tpu.concatenate %40, %40, %40, %40 in 0 : vector<8x32xf32>, vector<8x32xf32>, vector<8x32xf32>, vector<8x32xf32> -> vector<32x32xf32>
    %cst_31 = arith.constant 0.000000e+00 : f32
    %95 = vector.broadcast %cst_31 : f32 to vector<32x32xf32>
    %96 = arith.select %85, %94, %95 : vector<32x32xi1>, vector<32x32xf32>
    %cst_32 = arith.constant dense<0.000000e+00> : vector<8x32xf32>
    %97 = tpu.matmul %38, %93, %cst_32 {dimension_numbers = #tpu.dot_dimension_numbers<[1], [1], [0], [0], [0, 0, 1, 0], [], []>} : vector<8x32xf32>, vector<32x32xf32>, vector<8x32xf32> -> vector<8x32xf32>
    %cst_33 = arith.constant dense<0xFF800000> : vector<8xf32>
    %98 = vector.multi_reduction <maximumf>, %97, %cst_33 [1] : vector<8x32xf32> to vector<8xf32>
    %99 = vector.shape_cast %98 : vector<8xf32> to vector<8x1xf32>
    %100 = vector.broadcast %99 : vector<8x1xf32> to vector<8x32xf32>
    %101 = arith.subf %97, %100 : vector<8x32xf32>
    %102 = math.exp %101 : vector<8x32xf32>
    %cst_34 = arith.constant dense<0.000000e+00> : vector<8x32xf32>
    %103 = tpu.matmul %102, %90, %cst_34 {dimension_numbers = #tpu.dot_dimension_numbers<[1], [0], [0], [1], [0, 0, 1, 1], [], []>} : vector<8x32xf32>, vector<32x32xf32>, vector<8x32xf32> -> vector<8x32xf32>
    %104 = tpu.reciprocal %103 {approx = true} : vector<8x32xf32> -> vector<8x32xf32>
    %105 = arith.mulf %102, %104 : vector<8x32xf32>
    %cst_35 = arith.constant dense<0.000000e+00> : vector<8x32xf32>
    %106 = tpu.matmul %105, %96, %cst_35 {dimension_numbers = #tpu.dot_dimension_numbers<[1], [0], [0], [1], [0, 0, 1, 1], [], []>} : vector<8x32xf32>, vector<32x32xf32>, vector<8x32xf32> -> vector<8x32xf32>
    %cst_36 = arith.constant dense<0.000000e+00> : vector<8x32xf32>
    %107 = tpu.matmul %106, %2, %cst_36 {dimension_numbers = #tpu.dot_dimension_numbers<[1], [0], [0], [1], [0, 0, 1, 1], [], []>} : vector<8x32xf32>, vector<32x32xf32>, vector<8x32xf32> -> vector<8x32xf32>
    %108 = vector.broadcast %6 : vector<1x32xf32> to vector<8x32xf32>
    %109 = arith.addf %107, %108 : vector<8x32xf32>
    %110 = arith.addf %0, %109 : vector<8x32xf32>
    %cst_37 = arith.constant dense<0.000000e+00> : vector<8xf32>
    %111 = vector.multi_reduction <add>, %110, %cst_37 [1] : vector<8x32xf32> to vector<8xf32>
    %112 = vector.shape_cast %111 : vector<8xf32> to vector<8x1xf32>
    %cst_38 = arith.constant 3.200000e+01 : f32
    %113 = vector.broadcast %cst_38 : f32 to vector<8x1xf32>
    %114 = arith.divf %112, %113 : vector<8x1xf32>
    %115 = vector.broadcast %114 : vector<8x1xf32> to vector<8x32xf32>
    %116 = arith.subf %110, %115 : vector<8x32xf32>
    %117 = arith.mulf %116, %116 : vector<8x32xf32>
    %cst_39 = arith.constant dense<0.000000e+00> : vector<8xf32>
    %118 = vector.multi_reduction <add>, %117, %cst_39 [1] : vector<8x32xf32> to vector<8xf32>
    %119 = vector.shape_cast %118 : vector<8xf32> to vector<8x1xf32>
    %cst_40 = arith.constant 3.200000e+01 : f32
    %120 = vector.broadcast %cst_40 : f32 to vector<8x1xf32>
    %121 = arith.divf %119, %120 : vector<8x1xf32>
    %122 = vector.broadcast %114 : vector<8x1xf32> to vector<8x32xf32>
    %123 = arith.subf %110, %122 : vector<8x32xf32>
    %cst_41 = arith.constant 9.99999974E-6 : f32
    %124 = vector.broadcast %cst_41 : f32 to vector<8x1xf32>
    %125 = arith.addf %121, %124 : vector<8x1xf32>
    %126 = math.rsqrt %125 : vector<8x1xf32>
    %127 = vector.broadcast %126 : vector<8x1xf32> to vector<8x32xf32>
    %128 = arith.mulf %123, %127 : vector<8x32xf32>
    %129 = vector.broadcast %10 : vector<1x32xf32> to vector<8x32xf32>
    %130 = arith.mulf %128, %129 : vector<8x32xf32>
    %131 = vector.broadcast %11 : vector<1x32xf32> to vector<8x32xf32>
    %132 = arith.addf %130, %131 : vector<8x32xf32>
    %cst_42 = arith.constant dense<0.000000e+00> : vector<8x128xf32>
    %133 = tpu.matmul %132, %3, %cst_42 {dimension_numbers = #tpu.dot_dimension_numbers<[1], [0], [0], [1], [0, 0, 1, 1], [], []>} : vector<8x32xf32>, vector<32x128xf32>, vector<8x128xf32> -> vector<8x128xf32>
    %134 = vector.broadcast %7 : vector<1x128xf32> to vector<8x128xf32>
    %135 = arith.addf %133, %134 : vector<8x128xf32>
    %cst_43 = arith.constant 5.000000e-01 : f32
    %136 = vector.broadcast %cst_43 : f32 to vector<8x128xf32>
    %137 = arith.mulf %136, %135 : vector<8x128xf32>
    %cst_44 = arith.constant 0.707106769 : f32
    %138 = vector.broadcast %cst_44 : f32 to vector<8x128xf32>
    %139 = arith.mulf %135, %138 : vector<8x128xf32>
    %140 = math.erf %139 : vector<8x128xf32>
    %cst_45 = arith.constant 1.000000e+00 : f32
    %141 = vector.broadcast %cst_45 : f32 to vector<8x128xf32>
    %142 = arith.addf %141, %140 : vector<8x128xf32>
    %143 = arith.mulf %137, %142 : vector<8x128xf32>
    %cst_46 = arith.constant dense<0.000000e+00> : vector<8x32xf32>
    %144 = tpu.matmul %143, %4, %cst_46 {dimension_numbers = #tpu.dot_dimension_numbers<[1], [1], [0], [0], [0, 0, 1, 0], [], []>} : vector<8x128xf32>, vector<32x128xf32>, vector<8x32xf32> -> vector<8x32xf32>
    %145 = vector.broadcast %12 : vector<1x32xf32> to vector<8x32xf32>
    %146 = arith.addf %144, %145 : vector<8x32xf32>
    %147 = arith.addf %110, %146 : vector<8x32xf32>
    %c0_47 = arith.constant 0 : index
    %c0_48 = arith.constant 0 : index
    %148 = vector.load %arg4[%c0_47, %c0_48] : memref<8x32xf32, #tpu.memory_space<vmem>>, vector<8x32xf32>
    tpu.vector_store %arg4[%c0_47, %c0_48], %147 {strides = array<i32>} : memref<8x32xf32, #tpu.memory_space<vmem>>, vector<8x32xf32>,
    return
  }
  func.func @transform_0(%arg0: i32) -> (i32, i32) {
    %c0_i32 = arith.constant 0 : i32
    %c0_i32_0 = arith.constant 0 : i32
    return %arg0, %c0_i32 : i32, i32
  }
  func.func @transform_1(%arg0: i32) -> (i32, i32) {
    %c0_i32 = arith.constant 0 : i32
    %c0_i32_0 = arith.constant 0 : i32
    %c0_i32_1 = arith.constant 0 : i32
    return %c0_i32, %c0_i32_0 : i32, i32
  }
  func.func @transform_2(%arg0: i32) -> (i32, i32) {
    %c0_i32 = arith.constant 0 : i32
    %c0_i32_0 = arith.constant 0 : i32
    %c0_i32_1 = arith.constant 0 : i32
    return %c0_i32, %c0_i32_0 : i32, i32
  }
  func.func @transform_3(%arg0: i32) -> (i32, i32) {
    %c0_i32 = arith.constant 0 : i32
    %c0_i32_0 = arith.constant 0 : i32
    return %arg0, %c0_i32 : i32, i32
  }
}

</mosaic_0001>

<bundles_post_ra>
// kernel: tpu_custom_call.1
= control target key start
LH: loop header
LB: loop body
LE: loop exit
PB: predicated region body
PF: predicated region fallthrough
CT: control target
= control target key end

     0   :  { %8 = vsyncpa [#allocation3], 0  ;;  %s1747_s0 = inlined_call_operand.hbm [shape: f32[16,32], index: 0, kind: input, shape index: {}]   ;;  %s1748_s1 = inlined_call_operand.hbm [shape: f32[32,512], index: 1, kind: input, shape index: {}]   ;;  %s1749_s2 = inlined_call_operand.hbm [shape: f32[8,512], index: 2, kind: input, shape index: {}]   ;;  %s1750_s3 = inlined_call_operand.hbm [shape: f32[16,32], index: 3, kind: output, shape index: {}]  }
   0x1   :  { %10 = vsyncpa [#allocation3 + $0x1], 0 }
   0x2   :  { %11 = vsyncpa [#allocation6], 0 }
   0x3   :  { %12 = vsyncpa [#allocation4], 0 }
   0x4   :  { %14 = vsyncpa [#allocation4 + $0x1], 0  ;;  %s1459_s12 = smov 0   ;;  %s1461_s13 = smov 0  }
   0x5   :  { %s1463_s14 = smov 0   ;;  %s1465_s15 = smov 0  }
   0x6 LB: > { %s1480_s16 = sadd.s32 4294967295, %s1424_s15   ;;  %s982_s17 = sadd.s32 4294967294, %s1424_s15   ;;  %s1424_s15 = sphi %s1465_s15, %s1770_s15   ;;  %s1420_s14 = sphi %s1463_s14, %s1769_s14   ;;  %s1416_s13 = sphi %s1461_s13, %s1768_s13   ;;  %s1412_s12 = sphi %s1459_s12, %s1767_s12  }
   0x7   : > { %p40_p0 = scmp.ne.s32.totalorder %s1416_s13, %s1412_s12  ;;  %p1751_p1 = scmp.eq.s32.totalorder %s1480_s16, 0 }
   0x8   : > { %p112_p3 = scmp.eq.s32.totalorder %s982_s17, 1  ;;  %p983_p5 = scmp.ge.s32.totalorder %s1424_s15, 1 }
   0x9   : > { %p1489_p4 = por %p1751_p1, %p40_p0  ;;  %p119_p7 = scmp.lt.s32.totalorder %s1424_s15, 3 }
   0xa   : > { %p1494_p6 = por %p112_p3, %p40_p0  ;;  %s1426_s21 = smov [#allocation5]  }
   0xb   : > { %s1754_s18 = scalar_select %p1489_p4, 1, 0 }
   0xc   : > { %s1755_s19 = scalar_select %p1494_p6, 1, 0 }
   0xd   : > { %p1499_p8 = pnand %p983_p5, %p119_p7  ;;  %s131_s22 = sshll.u32 %s1426_s21, 4  ;;  %s1503_s22 = int_to_ptr.vmem [resolvable:$true] %s131_s22 }
   0xe   : > { %s1427_s24 = smov [#allocation7]   ;;  %s1268_s28 = scalar_lea.hbm %s1748_s1, 2048 }
   0xf   : > { %p1194_p9 = pneg %p1499_p8  ;;  %s145_s25 = sshll.u32 %s1427_s24, 4  ;;  %s1514_s25 = int_to_ptr.vmem [resolvable:$true] %s145_s25 }
  0x10   : > { %p1269_p12 = scmp.ne.s32.totalorder %s1748_s1, %s1268_s28  ;;  %p1275_p5 = scmp.lt.u32.totalorder %s1268_s28, %s1748_s1 }
  0x11   : > { %p1510_p11 = pnand %p1194_p9, %p1751_p1 }
  0x13   : > { %p1270_p13 = pneg %p1510_p11 }
  0x15   : > { %p1271_p0 = pnand %p1270_p13, %p1269_p12 }
  0x17   : > { %p1272_p3 = pneg %p1271_p0 }
  0x19   : > { %p1277_p7 = pnand %p1275_p5, %p1272_p3 }
  0x1b   : > { %1280 = shalt.err (!%p1277_p7)
}
  0x1c   : > { %s1281_s6 = scalar_lea.vmem %s1503_s22, 2048  ;;  %p1289_p2 = scmp.lt.s32.totalorder %s1503_s22, %s1503_s22 }
  0x1d   : > { %p1282_p9 = scmp.ne.s32.totalorder %s1503_s22, %s1281_s6  ;;  %p1290_p12 = scmp.lt.s32.totalorder %s1281_s6, %s1281_s6 }
  0x1f   : > { %p1284_p10 = pnand %p1282_p9, %p1270_p13  ;;  %p1291_p0 = por %p1290_p12, %p1289_p2 }
  0x21   : > { %p1285_p1 = pneg %p1284_p10 }
  0x23   : > { %p1292_p6 = pnand %p1291_p0, %p1285_p1 }
  0x25   : > { %1295 = shalt.err (!%p1292_p6)
}
  0x26   : > { %s1428_s7 = smov 512   ;;  %s1429_s8 = smov 32  }
  0x27   : > { %1197 = dma.hbm_to_vmem [thread:$0]  (!%p1510_p11), %s1748_s1, 2048, %s1503_s22, [#allocation6], %s1428_s7, %s1428_s7, %s1429_s8  }
  0x28   : > { %s1296_s21 = scalar_lea.hbm %s1749_s2, 512 }
  0x29   : > { %p1297_p2 = scmp.ne.s32.totalorder %s1749_s2, %s1296_s21  ;;  %p1303_p10 = scmp.lt.u32.totalorder %s1296_s21, %s1749_s2 }
  0x2b   : > { %p1299_p1 = pnand %p1297_p2, %p1270_p13 }
  0x2d   : > { %p1300_p6 = pneg %p1299_p1 }
  0x2f   : > { %p1305_p3 = pnand %p1303_p10, %p1300_p6 }
  0x31   : > { %1308 = shalt.err (!%p1305_p3)
}
  0x32   : > { %s1309_s22 = scalar_lea.vmem %s1514_s25, 512  ;;  %p1317_p12 = scmp.lt.s32.totalorder %s1514_s25, %s1514_s25 }
  0x33   : > { %p1310_p5 = scmp.ne.s32.totalorder %s1514_s25, %s1309_s22  ;;  %p1318_p0 = scmp.lt.s32.totalorder %s1309_s22, %s1309_s22 }
  0x35   : > { %p1312_p7 = pnand %p1310_p5, %p1270_p13  ;;  %p1319_p2 = por %p1318_p0, %p1317_p12 }
  0x37   : > { %p1313_p9 = pneg %p1312_p7 }
  0x39   : > { %p1320_p1 = pnand %p1319_p2, %p1313_p9 }
  0x3b   : > { %1323 = shalt.err (!%p1320_p1)
}
  0x3c   : > { %1200 = dma.hbm_to_vmem [thread:$0]  (!%p1510_p11), %s1749_s2, 512, %s1514_s25, [#allocation6]  }
  0x3d   : > { %s1569_s4 = sadd.s32 1, %s1424_s15   ;;  %s27_s23 = sadd.s32 1, %s1420_s14 }
  0x3e   : > { %s24_s5 = ssub.s32 %s1424_s15, %s1569_s4  ;;  %p34_p13 = scmp.ne.s32.totalorder %s1420_s14, %s1416_s13 }
  0x3f   : > { %p25_p6 = scmp.eq.s32.totalorder %s24_s5, 0  ;;  %p35_p10 = scmp.eq.s32.totalorder %s1424_s15, 0 }
  0x40   : > { %p1758_p3 = scmp.eq.s32.totalorder %s1480_s16, 1  ;;  %p1211_p7 = scmp.lt.s32.totalorder %s1424_s15, 2 }
  0x41   : > { %s1585_s7 = scalar_select %p25_p6, %s1420_s14, %s27_s23  }
  0x42   : > { %p1579_p5 = por %p1758_p3, %p34_p13  ;;  %p36_p9 = por %p35_p10, %p34_p13 }
  0x43   : > { %s156_s8 = sand.u32 1, %s1420_s14   ;;  %s988_s25 = sshll.u32 %s1424_s15, 7 }
  0x44   : > { %s1759_s6 = scalar_select %p1579_p5, 1, 0 }
  0x45   : > { %s987_s9 = sshll.u32 %s156_s8, 3  ;;  %s1592_s17 = scalar_lea.hbm %s1747_s0, %s988_s25 }
  0x46   : > { %s160_s21 = scalar_lea.vmem [#allocation2], %s987_s9  ;;  %p1596_p11 = pnand %p1211_p7, %p36_p9 }
  0x47   : > { %s167_s24 = sshll.u32 %s160_s21, 4  ;;  %s157_s27 = scalar_lea.sflag [#allocation3], %s156_s8  ;;  %s1594_s24 = int_to_ptr.vmem [resolvable:$true] %s167_s24 }
  0x48   : > { %s1324_s28 = scalar_lea.hbm %s1592_s17, 128  ;;  %p1326_p0 = pneg %p1596_p11 }
  0x49   : > { %p1325_p12 = scmp.ne.s32.totalorder %s1592_s17, %s1324_s28  ;;  %s1329_s30 = scalar_lea.hbm %s1747_s0, 256 }
  0x4a   : > { %p1330_p13 = scmp.lt.u32.totalorder %s1592_s17, %s1747_s0  ;;  %p1331_p6 = scmp.lt.u32.totalorder %s1329_s30, %s1324_s28 }
  0x4b   : > { %p1327_p2 = pnand %p1326_p0, %p1325_p12  ;;  %p1333_p3 = scmp.lt.u32.totalorder %s1324_s28, %s1592_s17 }
  0x4c   : > { %p1332_p10 = por %p1331_p6, %p1330_p13 }
  0x4d   : > { %p1328_p1 = pneg %p1327_p2 }
  0x4e   : > { %p1334_p7 = por %p1333_p3, %p1332_p10 }
  0x50   : > { %p1335_p9 = pnand %p1334_p7, %p1328_p1 }
  0x52   : > { %1338 = shalt.err (!%p1335_p9)
}
  0x53   : > { %s1339_s8 = scalar_lea.vmem %s1594_s24, 128  ;;  %s1430_s9 = smov [#allocation2]  }
  0x54   : > { %p1340_p12 = scmp.ne.s32.totalorder %s1594_s24, %s1339_s8  ;;  %s1344_s25 = sshll.u32 %s1430_s9, 4  ;;  %s1345_s25 = int_to_ptr.vmem [resolvable:$false] %s1344_s25 }
  0x55   : > { %s1346_s10 = scalar_lea.vmem %s1345_s25, 256  ;;  %p1347_p4 = scmp.lt.s32.totalorder %s1594_s24, %s1345_s25 }
  0x56   : > { %p1342_p2 = pnand %p1340_p12, %p1326_p0  ;;  %p1348_p13 = scmp.lt.s32.totalorder %s1346_s10, %s1339_s8 }
  0x58   : > { %p1343_p5 = pneg %p1342_p2  ;;  %p1349_p6 = por %p1348_p13, %p1347_p4 }
  0x5a   : > { %p1350_p10 = pnand %p1349_p6, %p1343_p5 }
  0x5c   : > { %1353 = shalt.err (!%p1350_p10)
}
  0x5d   : > { %1204 = dma.hbm_to_vmem [thread:$0]  (!%p1596_p11), %s1592_s17, 128, %s1594_s24, %s157_s27  }
  0x5e   : > { %176 = sbr.rel (%p1499_p8) target bundleno = 2563 (0xa03), region = 32  ;;  %s1628_s11 = sand.u32 (!%p1499_p8), 1, %s1416_s13  }
  0x5f   : > { %s990_s21 = sshll.u32 (!%p1499_p8), %s1628_s11, 3  ;;  %s179_s28 = scalar_lea.sflag (!%p1499_p8), [#allocation3], %s1628_s11 }
  0x60   : > { %s182_s22 = scalar_lea.vmem (!%p1499_p8), [#allocation2], %s990_s21  ;;  %p1761_p4 = scmp.ne.s32.totalorder (!%p1499_p8), %s1754_s18, 0 }
  0x65   : > { %1399 = dma.done.wait (%p1761_p4), %s179_s28, 128  }
  0x66   : > { %1401 = vsyncadd (%p1761_p4), %s179_s28, 4294967168  ;;  %p1762_p5 = scmp.eq.s32.totalorder %s1480_s16, 0 }
  0x68   : > { %1403 = dma.done.wait (%p1762_p5), [#allocation6], 2560   ;;  %p1763_p8 = pmov %p1762_p5 }
  0x69   : > { %vm238_vm0 = vcmask 261120   ;;  %v1642_v0 = vld [vmem:[%s182_s22] sm:$0xff]  ;;  %v214_v7 = vld [vmem:[#allocation5] sm:$0xff]  ;;  %v1431_v10 = vmov 0.0|0.0   ;;  %vm1432_vm1 = vmmov 0   ;;  %v1433_v13 = vmov 0.0  }
  0x6a   : > { %1405 = vsyncadd (%p1763_p8), [#allocation6], 4294964736  ;;  %v239_v1 = vsel %vm238_vm0, %v1642_v0, 0.0  ;;  %v215_v8 = vld [vmem:[#allocation5 + $0x20] sm:$0xff]  ;;  %1136 = vmatprep.subr.bf16.mxu0 %v1431_v10  ;;  %1067 = vmatprep.mubr.msk.f32.mxu0 %vm1432_vm1, %v1433_v13  ;;  %s1434_s18 = smov 64   ;;  %s1435_s20 = smov 96   ;;  %v365_v28 = vlaneseq }
  0x6b   : > { %240 = vadd.xlane.f32.xlu0 %v239_v1  ;;  %v216_v9 = vld [vmem:[#allocation5 + $0x40] sm:$0xff]  ;;  %v1137_v11 = vpack.c.bf16 %v215_v8, %v214_v7  ;;  %1142 = vmatprep.subr.bf16.mxu1 %v1431_v10  ;;  %v1436_v30 = vmov 0   ;;  %vm1144_vm7 = vmpackc.low %vm238_vm0, %vm238_vm0  ;;  %v1437_v46 = vmov 1.0|1.0   ;;  %v218_v53 = vld [vmem:[#allocation5 + $0x8] sm:$0xff]  ;;  %s1021_s17 = sshll.u32 %s1480_s16, 7 }
  0x6c   : > { %v217_v12 = vld [vmem:[#allocation5 + $0x60] sm:$0xff]  ;;  %1078 = vmatprep.mubr.msk.f32.mxu1 %vm1432_vm1, %v1433_v13  ;;  %v366_v29 = vand.u32 127, %v365_v28  ;;  %v219_v54 = vld [vmem:[#allocation5 + $0x28] sm:$0xff]  ;;  %v226_v28 = vld [vmem:[#allocation5 + $0x18] sm:$0xff]  ;;  %s212_s24 = scalar_lea.vmem [#allocation8], %s990_s21  ;;  %s1702_s30 = scalar_lea.hbm %s1750_s3, %s1021_s17 }
  0x6d   : > { %1138 = vmatpush3.bf16.msra.mxu0 %v1137_v11  ;;  %v1140_v14 = vpack.c.bf16 %v217_v12, %v216_v9  ;;  %v233_v19 = vld [vmem:[#allocation7 + $0x1] ss:$0 sm:$0xff]  ;;  %v234_v21 = vld [vmem:[#allocation7 + $0x2] ss:$0 sm:$0xff]  ;;  %v230_v24 = vld [vmem:[#allocation7] ss:$0 sm:$0xff]  ;;  %v1165_v56 = vpack.c.bf16 %v219_v54, %v218_v53 }
  0x6e   : > { %1139 = vmatprep.subr.bf16.mxu0 %v1431_v10  ;;  %vm367_vm2 = vcmp.ge.s32.totalorder %v366_v29, 8  ;;  %vm369_vm3 = vcmp.ge.s32.totalorder %v366_v29, 16  ;;  %vm372_vm4 = vcmp.ge.s32.totalorder %v366_v29, 24  ;;  %v220_v55 = vld [vmem:[#allocation5 + $0x48] sm:$0xff]  ;;  %v227_v29 = vld [vmem:[#allocation5 + $0x38] sm:$0xff]  ;;  %s893_s26 = sshll.u32 %s212_s24, 4  ;;  %s1704_s26 = int_to_ptr.vmem [resolvable:$true] %s893_s26 }
  0x6f   : > { %v368_v31 = vsel %vm367_vm2, 1, %v1436_v30  ;;  %v370_v32 = vsel %vm369_vm3, 1, %v1436_v30  ;;  %v373_v34 = vsel %vm372_vm4, 1, %v1436_v30  ;;  %v221_v57 = vld [vmem:[#allocation5 + $0x68] sm:$0xff]  ;;  %v1177_v30 = vpack.c.bf16 %v227_v29, %v226_v28  ;;  %s880_s23 = scalar_lea.sflag [#allocation4], %s1628_s11  ;;  %s1354_s16 = scalar_lea.vmem %s1704_s26, 128 }
  0x70   : > { %v371_v33 = vadd.s32 %v370_v32, %v368_v31  ;;  %v1168_v58 = vpack.c.bf16 %v221_v57, %v220_v55  ;;  %v228_v31 = vld [vmem:[#allocation5 + $0x58] sm:$0xff]  ;;  %p1355_p11 = scmp.ne.s32.totalorder %s1704_s26, %s1354_s16  ;;  %p1764_p0 = scmp.ne.s32.totalorder %s1759_s6, 0 }
  0x71   : > { %1141 = vmatpush3.bf16.msra.mxu0 %v1140_v14  ;;  %v229_v32 = vld [vmem:[#allocation5 + $0x78] sm:$0xff]  ;;  %s1438_s5 = smov [#allocation8]  }
  0x72   : > { %1150 = vmatprep.subr.bf16.mxu0 %v1431_v10  ;;  %v374_v35 = vadd.s32 %v373_v34, %v371_v33  ;;  %v1180_v33 = vpack.c.bf16 %v229_v32, %v228_v31  ;;  %v232_v34 = vld [vmem:[#allocation7 + $0x10] ss:$0 sm:$0xff]  ;;  %p1356_p1 = pnand %p1355_p11, %p1764_p0  ;;  %s1358_s8 = sshll.u32 %s1438_s5, 4  ;;  %s1359_s8 = int_to_ptr.vmem [resolvable:$false] %s1358_s8 }
  0x73   : > { %s1360_s9 = scalar_lea.vmem %s1359_s8, 256  ;;  %p1361_p7 = scmp.lt.s32.totalorder %s1704_s26, %s1359_s8 }
  0x74   : > { %vm995_vm5 = vcmp.eq.s32.totalorder %v374_v35, 0  ;;  %vm996_vm6 = vcmp.eq.s32.totalorder %v374_v35, 1  ;;  %vm997_vm8 = vcmp.eq.s32.totalorder %v374_v35, 2  ;;  %vm998_vm9 = vcmp.eq.s32.totalorder %v374_v35, 3  ;;  %p1357_p3 = pneg %p1356_p1  ;;  %p1362_p9 = scmp.lt.s32.totalorder %s1360_s9, %s1354_s16 }
  0x75   : > { %vm1151_vm10 = vmpackc.low %vm996_vm6, %vm995_vm5 }
  0x76   : > { %vm1154_vm11 = vmpackc.low %vm998_vm9, %vm997_vm8  ;;  %p1363_p12 = por %p1362_p9, %p1361_p7 }
  0x78   : > { %p1364_p2 = pnand %p1363_p12, %p1357_p3 }
  0xf8   : > { %v241_v2 = vpop.xlane.xlu0 %240 }
  0xf9   : > { %v243_v3 = vmul.f32 0.03125, %v241_v2  ;;  %v231_v2 = vld [vmem:[#allocation7 + $0x8] ss:$0 sm:$0xff] }
  0xfb   : > { %v244_v4 = vsub.f32 %v1642_v0, %v243_v3 }
  0xfd   : > { %v245_v5 = vmul.f32 %v244_v4, %v244_v4 }
  0xff   : > { %v246_v6 = vsel %vm238_vm0, %v245_v5, 0.0 }
 0x100   : > { %247 = vadd.xlane.f32.xlu0 %v246_v6 }
 0x18d   : > { %v248_v15 = vpop.xlane.xlu0 %247 }
 0x18e   : > { %v249_v16 = vmul.f32 0.03125, %v248_v15  ;;  %v222_v15 = vld [vmem:[#allocation5 + $0x10] sm:$0xff] }
 0x190   : > { %v250_v17 = vadd.f32 1e-05, %v249_v16  ;;  %v223_v16 = vld [vmem:[#allocation5 + $0x30] sm:$0xff] }
 0x192   : > { %1258 = vrsqrt.f32 %v250_v17  ;;  %v1171_v17 = vpack.c.bf16 %v223_v16, %v222_v15 }
 0x19c   : > { %v1259_v18 = vpop.eup %1258 }
 0x19d   : > { %v252_v20 = vmul.f32 %v1259_v18, %v244_v4  ;;  %v225_v18 = vld [vmem:[#allocation5 + $0x70] sm:$0xff] }
 0x19f   : > { %v253_v22 = vmul.f32 %v252_v20, %v233_v19 }
 0x1a1   : > { %v254_v23 = vadd.f32 %v253_v22, %v234_v21 }
 0x1a3   : > { %1068 = vmatmul.mubr.msk.f32.vlgmr.msra.gmra.mrb[0].mxu0 %vm238_vm0, %v254_v23  ;;  %v235_v23 = vld [vmem:[#allocation7 + $0x3] ss:$0 sm:$0xff] }
 0x1a4   : > { %1089 = vmatprep.mubr.msk.f32.mxu0 %vm1432_vm1, %v1433_v13  ;;  %1152 = vmatpush3.bf16.msk.msra.mxu0 %vm1151_vm10, %v1437_v46 }
 0x1a5   : > { %1153 = vmatprep.subr.bf16.mxu0 %v1431_v10 }
 0x1a8   : > { %1155 = vmatpush3.bf16.msk.msra.mxu0 %vm1154_vm11, %v1437_v46 }
 0x1a9   : > { %1156 = vmatprep.subr.bf16.mxu0 %v1431_v10 }
 0x276   : > { %v324_v25 = vpop.f32.mrb[0].mxu0 }
 0x277   : > { %v325_v26 = vadd.f32 %v324_v25, %v230_v24  ;;  %v1069_v27 = vpop.f32.mrb[1].mxu0  ;;  %v236_v25 = vld [vmem:[#allocation7 + $0x4] ss:$0 sm:$0xff] }
 0x279   : > { %395 = vrot.lane.b32.xlu0 %v325_v26, %s1434_s18  ;;  %388 = vrot.lane.b32.xlu1 %v325_v26, %s1435_s20 }
 0x2eb   : > { %v389_v36 = vpop.permute.xlu1 %388  ;;  %v396_v50 = vpop.permute.xlu0 %395 }
 0x2ec   : > { %v391_v37 = vsel %vm995_vm5, %v389_v36, 0.0  ;;  %v392_v38 = vsel %vm996_vm6, %v389_v36, 0.0  ;;  %v393_v40 = vsel %vm997_vm8, %v389_v36, 0.0  ;;  %v394_v41 = vsel %vm998_vm9, %v389_v36, 0.0 }
 0x2ed   : > { %v1143_v39 = vpack.c.bf16 %v392_v38, %v391_v37  ;;  %v1147_v42 = vpack.c.bf16 %v394_v41, %v393_v40  ;;  %v1157_v52 = vpack.c.bf16 %v396_v50, %v396_v50 }
 0x2ef   : > { %1145 = vmatpush3.bf16.xpose.msk.msra.mxu1 %vm1144_vm7, %v1143_v39 }
 0x2f0   : > { %1146 = vmatprep.subr.bf16.mxu1 %v1431_v10 }
 0x2f7   : > { %1149 = vmatpush3.bf16.xpose.msk.msra.mxu1 %vm1144_vm7, %v1147_v42 }
 0x2f8   : > { %1164 = vmatprep.subr.bf16.mxu1 %v1431_v10 }
 0x2fe   : > { %1079 = vmatmul.mubr.msk.f32.vlgmr.msra.gmra.mrb[0].mxu1 %vm238_vm0, %v325_v26 }
 0x2ff   : > { %1111 = vmatprep.mubr.msk.f32.mxu1 %vm1432_vm1, %v1433_v13  ;;  %1166 = vmatpush3.bf16.msra.mxu1 %v1165_v56 }
 0x300   : > { %1167 = vmatprep.subr.bf16.mxu1 %v1431_v10 }
 0x303   : > { %1169 = vmatpush3.bf16.msra.mxu1 %v1168_v58 }
 0x304   : > { %1176 = vmatprep.subr.bf16.mxu1 %v1431_v10 }
 0x3d1   : > { %v482_v43 = vpop.f32.mrb[0].mxu1 }
 0x3d2   : > { %v1080_v44 = vpop.f32.mrb[1].mxu1  ;;  %v486_v45 = vsel %vm238_vm0, %v482_v43, -inf }
 0x3d3   : > { %487 = vmax.xlane.f32.xlu1 %v486_v45 }
 0x460   : > { %v488_v47 = vpop.xlane.xlu1 %487 }
 0x461   : > { %v489_v48 = vsub.f32 %v482_v43, %v488_v47 }
 0x463   : > { %v490_v49 = vmul.f32 1.442695, %v489_v48 }
 0x465   : > { %1260 = vpow2.f32 %v490_v49 }
 0x46f   : > { %v1261_v51 = vpop.eup %1260 }
 0x470   : > { %1090 = vmatmul.mubr.msk.f32.vlgmr.msra.gmra.mrb[2].mxu0 %vm238_vm0, %v1261_v51 }
 0x471   : > { %1159 = vmatpush3.bf16.msk.msra.mxu0 %vm1151_vm10, %v1157_v52  ;;  %1100 = vmatprep.mubr.msk.f32.mxu0 %vm1432_vm1, %v1433_v13 }
 0x472   : > { %1160 = vmatprep.subr.bf16.mxu0 %v1431_v10 }
 0x475   : > { %1163 = vmatpush3.bf16.msk.msra.mxu0 %vm1154_vm11, %v1157_v52 }
 0x476   : > { %1170 = vmatprep.subr.bf16.mxu0 %v1431_v10 }
 0x543   : > { %v561_v59 = vpop.f32.mrb[2].mxu0 }
 0x544   : > { %1262 = vrcp.f32 %v561_v59  ;;  %v1091_v60 = vpop.f32.mrb[3].mxu0 }
 0x54e   : > { %v1263_v61 = vpop.eup %1262 }
 0x54f   : > { %v566_v62 = vmul.f32 %v1263_v61, %v1261_v51 }
 0x551   : > { %1101 = vmatmul.mubr.msk.f32.vlgmr.msra.gmra.mrb[4].mxu0 %vm238_vm0, %v566_v62 }
 0x552   : > { %1122 = vmatprep.mubr.msk.f32.mxu0 %vm1432_vm1, %v1433_v13  ;;  %1172 = vmatpush3.bf16.msra.mxu0 %v1171_v17 }
 0x553   : > { %1173 = vmatprep.subr.bf16.mxu0 %v1431_v10 }
 0x624   : > { %v636_v63 = vpop.f32.mrb[4].mxu0 }
 0x625   : > { %v1102_v1 = vpop.f32.mrb[5].mxu0  ;;  %1112 = vmatmul.mubr.msk.f32.vlgmr.msra.gmra.mrb[2].mxu1 %vm238_vm0, %v636_v63 }
 0x626   : > { %1133 = vmatprep.mubr.msk.f32.mxu1 %vm1432_vm1, %v1433_v13  ;;  %v224_v13 = vld [vmem:[#allocation5 + $0x50] sm:$0xff]  ;;  %1178 = vmatpush3.bf16.xpose.msra.mxu1 %v1177_v30 }
 0x627   : > { %v1174_v19 = vpack.c.bf16 %v225_v18, %v224_v13  ;;  %1179 = vmatprep.subr.bf16.mxu1 %v1431_v10  ;;  %v237_v10 = vld [vmem:[#allocation7 + $0x5] ss:$0 sm:$0xff] }
 0x629   : > { %1175 = vmatpush3.bf16.msra.mxu0 %v1174_v19 }
 0x62e   : > { %1181 = vmatpush3.bf16.xpose.msra.mxu1 %v1180_v33 }
 0x6f8   : > { %v709_v3 = vpop.f32.mrb[2].mxu1 }
 0x6f9   : > { %v710_v4 = vadd.f32 %v709_v3, %v231_v2  ;;  %v1113_v5 = vpop.f32.mrb[3].mxu1 }
 0x6fb   : > { %v713_v6 = vadd.f32 %v710_v4, %v1642_v0 }
 0x6fd   : > { %v714_v7 = vsel %vm238_vm0, %v713_v6, 0.0 }
 0x6fe   : > { %715 = vadd.xlane.f32.xlu0 %v714_v7 }
 0x78b   : > { %v716_v8 = vpop.xlane.xlu0 %715 }
 0x78c   : > { %v717_v9 = vmul.f32 0.03125, %v716_v8 }
 0x78e   : > { %v718_v11 = vsub.f32 %v713_v6, %v717_v9 }
 0x790   : > { %v719_v12 = vmul.f32 %v718_v11, %v718_v11 }
 0x792   : > { %v720_v14 = vsel %vm238_vm0, %v719_v12, 0.0 }
 0x793   : > { %721 = vadd.xlane.f32.xlu1 %v720_v14 }
 0x820   : > { %v722_v0 = vpop.xlane.xlu1 %721 }
 0x821   : > { %v723_v20 = vmul.f32 0.03125, %v722_v0 }
 0x823   : > { %v724_v21 = vadd.f32 1e-05, %v723_v20 }
 0x825   : > { %1264 = vrsqrt.f32 %v724_v21 }
 0x82f   : > { %v1265_v22 = vpop.eup %1264 }
 0x830   : > { %v726_v24 = vmul.f32 %v1265_v22, %v718_v11 }
 0x832   : > { %v727_v26 = vmul.f32 %v726_v24, %v235_v23 }
 0x834   : > { %v728_v27 = vadd.f32 %v727_v26, %v236_v25 }
 0x836   : > { %1123 = vmatmul.mubr.msk.f32.vlgmr.msra.gmra.mrb[6].mxu0 %vm238_vm0, %v728_v27 }
 0x909   : > { %v798_v35 = vpop.f32.mrb[6].mxu0 }
 0x90a   : > { %v799_v36 = vadd.f32 %v798_v35, %v232_v34  ;;  %v1124_v37 = vpop.f32.mrb[7].mxu0 }
 0x90c   : > { %v803_v38 = vmul.f32 0.70710677, %v799_v36  ;;  %v802_v40 = vmul.f32 0.5, %v799_v36 }
 0x90e   : > { %1266 = verf.f32 %v803_v38 }
 0x918   : > { %v1267_v39 = vpop.eup %1266 }
 0x919   : > { %v805_v41 = vadd.f32 1.0, %v1267_v39 }
 0x91b   : > { %v806_v42 = vmul.f32 %v805_v41, %v802_v40 }
 0x91d   : > { %1134 = vmatmul.mubr.f32.vlgmr.msra.gmra.mrb[4].mxu1 %v806_v42 }
 0x9f0   : > { %v873_v43 = vpop.f32.mrb[4].mxu1 }
 0x9f1   : > { %v874_v44 = vadd.f32 %v873_v43, %v237_v10  ;;  %v1135_v45 = vpop.f32.mrb[5].mxu1 }
 0x9f3   : > { %v877_v46 = vadd.f32 %v874_v44, %v713_v6 }
 0x9f5   : > { %878 = vst.msk [vmem:[%s212_s24] sm:$0xff] %vm238_vm0, %v877_v46 }
 0x9f6   : > { %1367 = shalt.err (!%p1364_p2)
}
 0x9f7   : > { %s1368_s25 = scalar_lea.hbm %s1702_s30, 128  ;;  %s1372_s21 = scalar_lea.hbm %s1750_s3, 256 }
 0x9f8   : > { %p1369_p13 = scmp.ne.s32.totalorder %s1702_s30, %s1368_s25  ;;  %p1373_p4 = scmp.lt.u32.totalorder %s1702_s30, %s1750_s3 }
 0x9f9   : > { %p1374_p5 = scmp.lt.u32.totalorder %s1372_s21, %s1368_s25  ;;  %p1376_p11 = scmp.lt.u32.totalorder %s1368_s25, %s1702_s30 }
 0x9fa   : > { %p1370_p6 = pnand %p1369_p13, %p1764_p0 }
 0x9fb   : > { %p1375_p8 = por %p1374_p5, %p1373_p4 }
 0x9fc   : > { %p1371_p10 = pneg %p1370_p6 }
 0x9fd   : > { %p1377_p1 = por %p1376_p11, %p1375_p8 }
 0x9ff   : > { %p1378_p3 = pnand %p1377_p1, %p1371_p10 }
 0xa01   : > { %1381 = shalt.err (!%p1378_p3)
}
 0xa02   : > { %1192 = dma.vmem_to_hbm [thread:$0]  (%p1764_p0), %s1704_s26, 128, %s1702_s30, %s880_s23  }
 0xa03 PF: > { %s905_s18 = sand.u32 1, %s1412_s12   ;;  %p1765_p7 = scmp.ne.s32.totalorder %s1755_s19, 0 }
 0xa04   : > { %p1766_p9 = scmp.ge.s32.totalorder %s1424_s15, 2  ;;  %s906_s20 = scalar_lea.sflag [#allocation4], %s905_s18 }
 0xa06   : > { %p1206_p12 = pnand %p1766_p9, %p1765_p7 }
 0xa08   : > { %1407 = dma.done.wait (!%p1206_p12), %s906_s20, 128  }
 0xa09   : > { %1409 = vsyncadd (!%p1206_p12), %s906_s20, 4294967168  ;;  %p17_p2 = scmp.ge.s32.totalorder %s1569_s4, 4   ;;  %s1767_s12 = smov %s1416_s13 }
 0xa0a   : > { %s1768_s13 = smov %s1420_s14  ;;  %s1769_s14 = smov %s1585_s7 }
 0xa0b   : > { %s1770_s15 = smov %s1569_s4  ;;  %19 = sbr.rel (!%p17_p2) target bundleno = 6 (0x6), region = 85 }
 0xa12   :  { %911 = vsyncpa [#allocation3], 1 }
 0xa13   :  { %913 = vsyncpa [#allocation3 + $0x1], 1 }
 0xa14   :  { %914 = vsyncpa [#allocation6], 1 }
 0xa15   :  { %915 = vsyncpa [#allocation4], 1 }
 0xa16   :  { %917 = vsyncpa [#allocation4 + $0x1], 1 }

</bundles_post_ra>
